<compile_context>
chip_gen: v6e
topology: v6e:2x2x1
jax: 0.10.0
libtpu: 0.0.40
codegen_flags: <defaults>
</compile_context>

<pallas_src>
import functools

import jax
import jax.numpy as jnp
from jax import lax
from jax.experimental import pallas as pl
from jax.experimental.pallas import tpu as pltpu

EPS = 1e-5  # matches DeepDA pdist(sample_1, sample_2, norm=2, eps=1e-5)


# ---------------------------------------------------------------------------
# VMEM budgeting / tile selection
# ---------------------------------------------------------------------------
def _vmem_budget_bytes():
    """~70% of physical VMEM (v5e/v6e 128 MiB, v7x 64 MiB); safe fallback."""
    try:
        info = pltpu.get_tpu_info()
        phys = int(getattr(info, "vmem_capacity_bytes", 64 * 1024 * 1024))
    except Exception:
        phys = 64 * 1024 * 1024
    return int(phys * 0.7)


def _pick_row_tile(n1, n2, d, h1, w1_bytes, budget_bytes, step):
    """Largest divisor of n1 (multiple of `step`) whose working set fits VMEM."""
    best = None
    r = step
    while r <= n1:
        if n1 % r == 0:
            foot = (2 * r * n2 * h1 * w1_bytes   # W1 slab (double-buffered)
                    + 2 * r * d * 4              # x tile  (double-buffered)
                    + r * n2 * 4                 # Gram tile
                    + n2 * n2 * h1 * 4           # layer-1 GEMM result
                    + 4 * n2 * d * 4)            # y, ||y||^2, misc headroom
            if foot <= budget_bytes:
                best = r
        r += step
    return best if best is not None else step


# ---------------------------------------------------------------------------
# Fused kernel: Gram tile -> layer-1 GEMM accumulation -> (last step) MLP tail
# ---------------------------------------------------------------------------
def make_fused_kernel(n2, h1_dim, n_layers, w1_dtype):
    """Ref order: x, y, yy, b1, W1(2d view), [W2, b2, ..., WL, bL], out, h1_acc."""

    def kernel(x_ref, y_ref, yy_ref, b1_ref, w1_ref, *rest):
        o_ref = rest[-2]
        h1_acc = rest[-1]
        tail_wb = rest[:-2]            # (w2, b2, ..., wL, bL) refs
        t = pl.program_id(0)

        @pl.when(t == 0)
        def _init():
            h1_acc[...] = jnp.zeros_like(h1_acc)

        # ---- Gram tile, lane-dense orientation: (N2, row_tile) ----
        x = x_ref[...]                               # (row_tile, D)
        y = y_ref[...]                               # (N2, D) resident
        yy = yy_ref[...]                             # (N2, 1)  hoisted to wrapper
        # ||x_r||^2 as a (1, row_tile) ROW via a ones-vector MXU dot -> no
        # sublane->lane relayout of a column reduce.
        ones_row = jnp.ones((1, x.shape[1]), jnp.float32)
        xx = lax.dot_general(ones_row, x * x, (((1,), (1,)), ((), ())),
                             preferred_element_type=jnp.float32)      # (1, row_tile)
        # y . x^T by contracting the LAST dims -> no transpose materialized.
        yx = lax.dot_general(y, x, (((1,), (1,)), ((), ())),
                             preferred_element_type=jnp.float32)      # (N2, row_tile)
        gram_t = jnp.sqrt(EPS + jnp.abs(xx + yy - 2.0 * yx))          # (N2, row_tile)

        # ---- MLP layer 1: ONE GEMM per grid step ----
        # W1 block is the row-major 2D view (row_tile, N2*H1) of W1[i*N2+j, h].
        # (N2, row_tile) @ (row_tile, N2*H1) -> (N2, N2*H1); the block-diagonal
        # slices [j, j*H1:(j+1)*H1] are exactly this tile's contribution to
        # flatten @ W1.  The off-diagonal extra MXU work (factor N2) is
        # negligible next to the HBM-bound W1 stream.
        big = jnp.dot(gram_t.astype(w1_dtype), w1_ref[...],
                      preferred_element_type=jnp.float32)             # (N2, N2*H1)
        partial = big[0:1, 0:h1_dim]
        for j in range(1, n2):
            partial = partial + big[j:j + 1, j * h1_dim:(j + 1) * h1_dim]
        h1_acc[...] += partial

        # ---- finalize: bias, ReLUs, remaining layers, sigmoid ----
        @pl.when(t == pl.num_programs(0) - 1)
        def _finalize():
            h = h1_acc[...] + b1_ref[...]
            if n_layers > 1:
                h = jnp.maximum(h, 0.0)                # ReLU on hidden layer 1
            for li in range(n_layers - 1):
                w = tail_wb[2 * li][...]
                b = tail_wb[2 * li + 1][...]
                h = jnp.dot(h, w, preferred_element_type=jnp.float32) + b
                if li < n_layers - 2:
                    h = jnp.maximum(h, 0.0)            # ReLU on remaining hiddens
            o_ref[...] = jax.nn.sigmoid(h)             # torch.sigmoid

    return kernel


# ---------------------------------------------------------------------------
# Wrapper
# ---------------------------------------------------------------------------
@functools.partial(jax.jit,
                   static_argnames=("row_tile", "vmem_limit", "w1_bf16"))
def _gnet_gram_forward_impl(x, y, weights, biases, *, row_tile, vmem_limit,
                            w1_bf16):
    n1, d = x.shape
    n2 = y.shape[0]
    n_layers = len(weights)
    h1_dim = weights[0].shape[1]
    n_out = weights[-1].shape[1]

    w1_dtype = jnp.bfloat16 if w1_bf16 else jnp.float32
    # Row-major 2D view of W1: (N1*N2, H1) -> (N1, N2*H1).  Contiguity is
    # preserved, so this reshape (and the optional bf16 cast) happens once,
    # outside the kernel; layer 1 then consumes Gram tiles with no in-kernel
    # flatten.
    w1_2d = weights[0].reshape(n1, n2 * h1_dim).astype(w1_dtype)
    yy = jnp.sum(y * y, axis=1, keepdims=True)        # (N2, 1), hoisted once

    args = [x, y, yy, biases[0], w1_2d]
    in_specs = [
        pl.BlockSpec((row_tile, d), lambda t: (t, 0)),               # x tile
        pl.BlockSpec((n2, d), lambda t: (0, 0)),                     # y (resident)
        pl.BlockSpec((n2, 1), lambda t: (0, 0)),                     # ||y||^2
        pl.BlockSpec((1, h1_dim), lambda t: (0, 0)),                 # b1
        pl.BlockSpec((row_tile, n2 * h1_dim), lambda t: (t, 0)),     # W1 slab
    ]
    for w, b in zip(weights[1:], biases[1:]):
        args.append(w)
        in_specs.append(pl.BlockSpec(w.shape, lambda t: (0, 0)))
        args.append(b)
        in_specs.append(pl.BlockSpec(b.shape, lambda t: (0, 0)))

    out = pl.pallas_call(
        make_fused_kernel(n2, h1_dim, n_layers, w1_dtype),
        out_shape=jax.ShapeDtypeStruct((1, n_out), jnp.float32),
        grid_spec=pltpu.PrefetchScalarGridSpec(
            num_scalar_prefetch=0,
            grid=(n1 // row_tile,),
            in_specs=in_specs,
            out_specs=pl.BlockSpec((1, n_out), lambda t: (0, 0)),
            scratch_shapes=[pltpu.VMEM((1, h1_dim), jnp.float32)],
        ),
        compiler_params=pltpu.CompilerParams(
            # The single grid axis accumulates MLP layer 1 -> reduction axis.
            dimension_semantics=("arbitrary",),
            vmem_limit_bytes=vmem_limit,
        ),
    )(*args)
    return out[0]                                                    # (n_output,)


def gnet_gram_forward(x, y, weights, biases, *, row_tile=None, w1_bf16=False):
    n1, d = x.shape
    n2 = y.shape[0]
    h1_dim = weights[0].shape[1]
    assert weights[0].shape[0] == n1 * n2, "W1 rows must equal N1*N2"

    step = 16 if w1_bf16 else 8          # bf16 packs 16 rows per native tile
    assert n1 % step == 0, f"N1 must be a multiple of {step}"
    budget = _vmem_budget_bytes()
    if row_tile is None:
        row_tile = _pick_row_tile(n1, n2, d, h1_dim,
                                  2 if w1_bf16 else 4, budget, step)
    assert n1 % row_tile == 0 and row_tile % step == 0
    return _gnet_gram_forward_impl(
        x, y, tuple(weights), tuple(biases),
        row_tile=int(row_tile), vmem_limit=int(budget), w1_bf16=bool(w1_bf16))


# ---------------------------------------------------------------------------
# Parameter init (deterministic synthetic)
# ---------------------------------------------------------------------------
def init_gnet_gram_params(key, n_input, n_hiddens, n_output):
    dims = [n_input] + list(n_hiddens) + [n_output]
    weights, biases = [], []
    for i in range(len(dims) - 1):
        key, kw, kb = jax.random.split(key, 3)
        w = 0.1 * jax.random.normal(kw, (dims[i], dims[i + 1]), dtype=jnp.float32)
        b = 0.01 * jax.random.normal(kb, (1, dims[i + 1]), dtype=jnp.float32)
        weights.append(w)
        biases.append(b)
    return weights, biases


if __name__ == "__main__":
    key = jax.random.PRNGKey(0)
    kx, ky, kp = jax.random.split(key, 3)

    # Small shapes consistent with the module: N1/N2 samples of D-dim features,
    # MLP input dim = N1 * N2 (flattened Gram matrix).
    N1, N2, D = 32, 8, 32
    n_input = N1 * N2
    n_hiddens = [32, 16]
    n_output = 1

    x = jax.random.normal(kx, (N1, D), dtype=jnp.float32)
    y = jax.random.normal(ky, (N2, D), dtype=jnp.float32)
    weights, biases = init_gnet_gram_params(kp, n_input, n_hiddens, n_output)

    # Pure-JAX reference of the same math (pdist -> flatten -> MLP -> sigmoid).
    def ref(x, y):
        d2 = (jnp.sum(x * x, 1)[:, None] + jnp.sum(y * y, 1)[None, :]
              - 2.0 * x @ y.T)
        g = jnp.sqrt(EPS + jnp.abs(d2)).reshape(1, -1)
        h = g
        for i, (w, b) in enumerate(zip(weights, biases)):
            h = h @ w + b
            if i < len(weights) - 1:
                h = jnp.maximum(h, 0.0)
        return jax.nn.sigmoid(h)[0]

    expected = ref(x, y)

    # 1) f32, small explicit row_tile -> exercises the multi-step reduction.
    out_small = gnet_gram_forward(x, y, weights, biases, row_tile=8)
    jax.block_until_ready(out_small)
    assert jnp.allclose(out_small, expected, atol=1e-4, rtol=1e-4), "f32 tiled mismatch"

    # 2) f32, auto row_tile (largest W1 slab that fits the VMEM budget).
    out_auto = gnet_gram_forward(x, y, weights, biases)
    jax.block_until_ready(out_auto)
    assert jnp.allclose(out_auto, expected, atol=1e-4, rtol=1e-4), "f32 auto mismatch"

    # 3) bf16-streamed W1 (halves the dominant HBM traffic), looser tolerance.
    out_bf16 = gnet_gram_forward(x, y, weights, biases, w1_bf16=True)
    jax.block_until_ready(out_bf16)
    assert jnp.allclose(out_bf16, expected, atol=5e-2), "bf16 W1 mismatch"

    print("KERNEL_OK")
</pallas_src>

<mosaic_0001>
module attributes {stable_mosaic.version = 11 : i64} {
  func.func @kernel(%arg0: i32, %arg1: memref<8x32xf32, #tpu.memory_space<vmem>>, %arg2: memref<8x32xf32, #tpu.memory_space<vmem>>, %arg3: memref<8x1xf32, #tpu.memory_space<vmem>>, %arg4: memref<1x32xf32, #tpu.memory_space<vmem>>, %arg5: memref<8x256xf32, #tpu.memory_space<vmem>>, %arg6: memref<32x16xf32, #tpu.memory_space<vmem>>, %arg7: memref<1x16xf32, #tpu.memory_space<vmem>>, %arg8: memref<16x1xf32, #tpu.memory_space<vmem>>, %arg9: memref<1x1xf32, #tpu.memory_space<vmem>>, %arg10: memref<1x1xf32, #tpu.memory_space<vmem>>, %arg11: memref<1x32xf32, #tpu.memory_space<vmem>>) attributes {dimension_semantics = [#tpu.dimension_semantics<arbitrary>], iteration_bounds = array<i64: 4>, scalar_prefetch = 0 : i64, scratch_operands = 1 : i64, tpu.core_type = #tpu.core_type<tc>, window_params = [{transform_indices = @transform_0, window_bounds = array<i64: 8, 32>}, {pipeline_mode = #tpu.pipeline_mode<synchronous>, transform_indices = @transform_1, window_bounds = array<i64: 8, 32>}, {pipeline_mode = #tpu.pipeline_mode<synchronous>, transform_indices = @transform_2, window_bounds = array<i64: 8, 1>}, {pipeline_mode = #tpu.pipeline_mode<synchronous>, transform_indices = @transform_3, window_bounds = array<i64: 1, 32>}, {transform_indices = @transform_4, window_bounds = array<i64: 8, 256>}, {pipeline_mode = #tpu.pipeline_mode<synchronous>, transform_indices = @transform_5, window_bounds = array<i64: 32, 16>}, {pipeline_mode = #tpu.pipeline_mode<synchronous>, transform_indices = @transform_6, window_bounds = array<i64: 1, 16>}, {pipeline_mode = #tpu.pipeline_mode<synchronous>, transform_indices = @transform_7, window_bounds = array<i64: 16, 1>}, {pipeline_mode = #tpu.pipeline_mode<synchronous>, transform_indices = @transform_8, window_bounds = array<i64: 1, 1>}, {pipeline_mode = #tpu.pipeline_mode<synchronous>, transform_indices = @transform_9, window_bounds = array<i64: 1, 1>}]} {
    %c0_i32 = arith.constant 0 : i32
    %0 = arith.cmpi eq, %arg0, %c0_i32 : i32
    %1 = arith.extui %0 : i1 to i32
    %c0_i32_0 = arith.constant 0 : i32
    %2 = arith.cmpi ne, %1, %c0_i32_0 : i32
    scf.if %2 {
      %cst_18 = arith.constant 0.000000e+00 : f32
      %43 = vector.broadcast %cst_18 : f32 to vector<1x32xf32>
      %c0_19 = arith.constant 0 : index
      %c0_20 = arith.constant 0 : index
      %44 = vector.load %arg11[%c0_19, %c0_20] : memref<1x32xf32, #tpu.memory_space<vmem>>, vector<1x32xf32>
      tpu.vector_store %arg11[%c0_19, %c0_20], %43 {strides = array<i32>} : memref<1x32xf32, #tpu.memory_space<vmem>>, vector<1x32xf32>,
    } else {
    }
    %c0 = arith.constant 0 : index
    %c0_1 = arith.constant 0 : index
    %3 = vector.load %arg1[%c0, %c0_1] : memref<8x32xf32, #tpu.memory_space<vmem>>, vector<8x32xf32>
    %c0_2 = arith.constant 0 : index
    %c0_3 = arith.constant 0 : index
    %4 = vector.load %arg2[%c0_2, %c0_3] : memref<8x32xf32, #tpu.memory_space<vmem>>, vector<8x32xf32>
    %c0_4 = arith.constant 0 : index
    %c0_5 = arith.constant 0 : index
    %5 = vector.load %arg3[%c0_4, %c0_5] : memref<8x1xf32, #tpu.memory_space<vmem>>, vector<8x1xf32>
    %cst = arith.constant 1.000000e+00 : f32
    %6 = vector.broadcast %cst : f32 to vector<1x32xf32>
    %7 = arith.mulf %3, %3 : vector<8x32xf32>
    %cst_6 = arith.constant dense<0.000000e+00> : vector<1x8xf32>
    %8 = tpu.matmul %6, %7, %cst_6 {dimension_numbers = #tpu.dot_dimension_numbers<[1], [1], [0], [0], [0, 0, 1, 0], [], []>} : vector<1x32xf32>, vector<8x32xf32>, vector<1x8xf32> -> vector<1x8xf32>
    %cst_7 = arith.constant dense<0.000000e+00> : vector<8x8xf32>
    %9 = tpu.matmul %4, %3, %cst_7 {dimension_numbers = #tpu.dot_dimension_numbers<[1], [1], [0], [0], [0, 0, 1, 0], [], []>} : vector<8x32xf32>, vector<8x32xf32>, vector<8x8xf32> -> vector<8x8xf32>
    %10 = vector.broadcast %8 : vector<1x8xf32> to vector<8x8xf32>
    %11 = vector.broadcast %5 : vector<8x1xf32> to vector<8x8xf32>
    %12 = arith.addf %10, %11 : vector<8x8xf32>
    %cst_8 = arith.constant 2.000000e+00 : f32
    %13 = vector.broadcast %cst_8 : f32 to vector<8x8xf32>
    %14 = arith.mulf %13, %9 : vector<8x8xf32>
    %15 = arith.subf %12, %14 : vector<8x8xf32>
    %16 = math.absf %15 : vector<8x8xf32>
    %cst_9 = arith.constant 9.99999974E-6 : f32
    %17 = vector.broadcast %cst_9 : f32 to vector<8x8xf32>
    %18 = arith.addf %17, %16 : vector<8x8xf32>
    %19 = math.sqrt %18 : vector<8x8xf32>
    %c0_10 = arith.constant 0 : index
    %c0_11 = arith.constant 0 : index
    %20 = vector.load %arg5[%c0_10, %c0_11] : memref<8x256xf32, #tpu.memory_space<vmem>>, vector<8x256xf32>
    %cst_12 = arith.constant dense<0.000000e+00> : vector<8x256xf32>
    %21 = tpu.matmul %19, %20, %cst_12 {dimension_numbers = #tpu.dot_dimension_numbers<[1], [0], [0], [1], [0, 0, 1, 1], [], []>} : vector<8x8xf32>, vector<8x256xf32>, vector<8x256xf32> -> vector<8x256xf32>
    %22 = vector.extract_strided_slice %21 {offsets = [0, 0], sizes = [1, 32], strides = [1, 1]} : vector<8x256xf32> to vector<1x32xf32>
    %23 = vector.extract_strided_slice %21 {offsets = [1, 32], sizes = [1, 32], strides = [1, 1]} : vector<8x256xf32> to vector<1x32xf32>
    %24 = arith.addf %22, %23 : vector<1x32xf32>
    %25 = vector.extract_strided_slice %21 {offsets = [2, 64], sizes = [1, 32], strides = [1, 1]} : vector<8x256xf32> to vector<1x32xf32>
    %26 = arith.addf %24, %25 : vector<1x32xf32>
    %27 = vector.extract_strided_slice %21 {offsets = [3, 96], sizes = [1, 32], strides = [1, 1]} : vector<8x256xf32> to vector<1x32xf32>
    %28 = arith.addf %26, %27 : vector<1x32xf32>
    %29 = vector.extract_strided_slice %21 {offsets = [4, 128], sizes = [1, 32], strides = [1, 1]} : vector<8x256xf32> to vector<1x32xf32>
    %30 = arith.addf %28, %29 : vector<1x32xf32>
    %31 = vector.extract_strided_slice %21 {offsets = [5, 160], sizes = [1, 32], strides = [1, 1]} : vector<8x256xf32> to vector<1x32xf32>
    %32 = arith.addf %30, %31 : vector<1x32xf32>
    %33 = vector.extract_strided_slice %21 {offsets = [6, 192], sizes = [1, 32], strides = [1, 1]} : vector<8x256xf32> to vector<1x32xf32>
    %34 = arith.addf %32, %33 : vector<1x32xf32>
    %35 = vector.extract_strided_slice %21 {offsets = [7, 224], sizes = [1, 32], strides = [1, 1]} : vector<8x256xf32> to vector<1x32xf32>
    %36 = arith.addf %34, %35 : vector<1x32xf32>
    %c0_13 = arith.constant 0 : index
    %c0_14 = arith.constant 0 : index
    %37 = vector.load %arg11[%c0_13, %c0_14] : memref<1x32xf32, #tpu.memory_space<vmem>>, vector<1x32xf32>
    %38 = arith.addf %37, %36 : vector<1x32xf32>
    %c0_15 = arith.constant 0 : index
    %c0_16 = arith.constant 0 : index
    %39 = vector.load %arg11[%c0_15, %c0_16] : memref<1x32xf32, #tpu.memory_space<vmem>>, vector<1x32xf32>
    tpu.vector_store %arg11[%c0_15, %c0_16], %38 {strides = array<i32>} : memref<1x32xf32, #tpu.memory_space<vmem>>, vector<1x32xf32>,
    %c3_i32 = arith.constant 3 : i32
    %40 = arith.cmpi eq, %arg0, %c3_i32 : i32
    %41 = arith.extui %40 : i1 to i32
    %c0_i32_17 = arith.constant 0 : i32
    %42 = arith.cmpi ne, %41, %c0_i32_17 : i32
    scf.if %42 {
      %c0_18 = arith.constant 0 : index
      %c0_19 = arith.constant 0 : index
      %43 = vector.load %arg11[%c0_18, %c0_19] : memref<1x32xf32, #tpu.memory_space<vmem>>, vector<1x32xf32>
      %c0_20 = arith.constant 0 : index
      %c0_21 = arith.constant 0 : index
      %44 = vector.load %arg4[%c0_20, %c0_21] : memref<1x32xf32, #tpu.memory_space<vmem>>, vector<1x32xf32>
      %45 = arith.addf %43, %44 : vector<1x32xf32>
      %cst_22 = arith.constant 0.000000e+00 : f32
      %46 = vector.broadcast %cst_22 : f32 to vector<1x32xf32>
      %47 = arith.maximumf %45, %46 : vector<1x32xf32>
      %c0_23 = arith.constant 0 : index
      %c0_24 = arith.constant 0 : index
      %48 = vector.load %arg6[%c0_23, %c0_24] : memref<32x16xf32, #tpu.memory_space<vmem>>, vector<32x16xf32>
      %c0_25 = arith.constant 0 : index
      %c0_26 = arith.constant 0 : index
      %49 = vector.load %arg7[%c0_25, %c0_26] : memref<1x16xf32, #tpu.memory_space<vmem>>, vector<1x16xf32>
      %cst_27 = arith.constant dense<0.000000e+00> : vector<1x16xf32>
      %50 = tpu.matmul %47, %48, %cst_27 {dimension_numbers = #tpu.dot_dimension_numbers<[1], [0], [0], [1], [0, 0, 1, 1], [], []>} : vector<1x32xf32>, vector<32x16xf32>, vector<1x16xf32> -> vector<1x16xf32>
      %51 = arith.addf %50, %49 : vector<1x16xf32>
      %cst_28 = arith.constant 0.000000e+00 : f32
      %52 = vector.broadcast %cst_28 : f32 to vector<1x16xf32>
      %53 = arith.maximumf %51, %52 : vector<1x16xf32>
      %c0_29 = arith.constant 0 : index
      %c0_30 = arith.constant 0 : index
      %54 = vector.load %arg8[%c0_29, %c0_30] : memref<16x1xf32, #tpu.memory_space<vmem>>, vector<16x1xf32>
      %c0_31 = arith.constant 0 : index
      %c0_32 = arith.constant 0 : index
      %55 = vector.load %arg9[%c0_31, %c0_32] : memref<1x1xf32, #tpu.memory_space<vmem>>, vector<1x1xf32>
      %cst_33 = arith.constant dense<0.000000e+00> : vector<1x1xf32>
      %56 = tpu.matmul %53, %54, %cst_33 {dimension_numbers = #tpu.dot_dimension_numbers<[1], [0], [0], [1], [0, 0, 1, 1], [], []>} : vector<1x16xf32>, vector<16x1xf32>, vector<1x1xf32> -> vector<1x1xf32>
      %57 = arith.addf %56, %55 : vector<1x1xf32>
      %58 = arith.negf %57 : vector<1x1xf32>
      %59 = math.exp %58 : vector<1x1xf32>
      %cst_34 = arith.constant 1.000000e+00 : f32
      %60 = vector.broadcast %cst_34 : f32 to vector<1x1xf32>
      %61 = arith.addf %60, %59 : vector<1x1xf32>
      %62 = arith.divf %60, %61 : vector<1x1xf32>
      %c0_35 = arith.constant 0 : index
      %c0_36 = arith.constant 0 : index
      %63 = vector.load %arg10[%c0_35, %c0_36] : memref<1x1xf32, #tpu.memory_space<vmem>>, vector<1x1xf32>
      tpu.vector_store %arg10[%c0_35, %c0_36], %62 {strides = array<i32>} : memref<1x1xf32, #tpu.memory_space<vmem>>, vector<1x1xf32>,
    } else {
    }
    return
  }
  func.func @transform_0(%arg0: i32) -> (i32, i32) {
    %c0_i32 = arith.constant 0 : i32
    %c0_i32_0 = arith.constant 0 : i32
    return %arg0, %c0_i32 : i32, i32
  }
  func.func @transform_1(%arg0: i32) -> (i32, i32) {
    %c0_i32 = arith.constant 0 : i32
    %c0_i32_0 = arith.constant 0 : i32
    %c0_i32_1 = arith.constant 0 : i32
    return %c0_i32, %c0_i32_0 : i32, i32
  }
  func.func @transform_2(%arg0: i32) -> (i32, i32) {
    %c0_i32 = arith.constant 0 : i32
    %c0_i32_0 = arith.constant 0 : i32
    %c0_i32_1 = arith.constant 0 : i32
    return %c0_i32, %c0_i32_0 : i32, i32
  }
  func.func @transform_3(%arg0: i32) -> (i32, i32) {
    %c0_i32 = arith.constant 0 : i32
    %c0_i32_0 = arith.constant 0 : i32
    %c0_i32_1 = arith.constant 0 : i32
    return %c0_i32, %c0_i32_0 : i32, i32
  }
  func.func @transform_4(%arg0: i32) -> (i32, i32) {
    %c0_i32 = arith.constant 0 : i32
    %c0_i32_0 = arith.constant 0 : i32
    return %arg0, %c0_i32 : i32, i32
  }
  func.func @transform_5(%arg0: i32) -> (i32, i32) {
    %c0_i32 = arith.constant 0 : i32
    %c0_i32_0 = arith.constant 0 : i32
    %c0_i32_1 = arith.constant 0 : i32
    return %c0_i32, %c0_i32_0 : i32, i32
  }
  func.func @transform_6(%arg0: i32) -> (i32, i32) {
    %c0_i32 = arith.constant 0 : i32
    %c0_i32_0 = arith.constant 0 : i32
    %c0_i32_1 = arith.constant 0 : i32
    return %c0_i32, %c0_i32_0 : i32, i32
  }
  func.func @transform_7(%arg0: i32) -> (i32, i32) {
    %c0_i32 = arith.constant 0 : i32
    %c0_i32_0 = arith.constant 0 : i32
    %c0_i32_1 = arith.constant 0 : i32
    return %c0_i32, %c0_i32_0 : i32, i32
  }
  func.func @transform_8(%arg0: i32) -> (i32, i32) {
    %c0_i32 = arith.constant 0 : i32
    %c0_i32_0 = arith.constant 0 : i32
    %c0_i32_1 = arith.constant 0 : i32
    return %c0_i32, %c0_i32_0 : i32, i32
  }
  func.func @transform_9(%arg0: i32) -> (i32, i32) {
    %c0_i32 = arith.constant 0 : i32
    %c0_i32_0 = arith.constant 0 : i32
    %c0_i32_1 = arith.constant 0 : i32
    return %c0_i32, %c0_i32_0 : i32, i32
  }
}

</mosaic_0001>

<bundles_post_ra>
// kernel: _gnet_gram_forward_impl.1
= control target key start
LH: loop header
LB: loop body
LE: loop exit
PB: predicated region body
PF: predicated region fallthrough
CT: control target
= control target key end

     0   :  { %s1132_s0 = inlined_call_operand.vmem [shape: f32[32,32], index: 0, kind: input, shape index: {}]   ;;  %s1133_s1 = inlined_call_operand.vmem [shape: f32[8,32], index: 1, kind: input, shape index: {}]   ;;  %s1134_s2 = inlined_call_operand.vmem [shape: f32[8,1], index: 2, kind: input, shape index: {}]   ;;  %s1135_s3 = inlined_call_operand.vmem [shape: f32[1,32], index: 3, kind: input, shape index: {}]   ;;  %s1136_s4 = inlined_call_operand.vmem [shape: f32[32,256], index: 4, kind: input, shape index: {}]   ;;  %s1137_s5 = inlined_call_operand.vmem [shape: f32[32,16], index: 5, kind: input, shape index: {}]   ;;  %s1138_s6 = inlined_call_operand.vmem [shape: f32[1,16], index: 6, kind: input, shape index: {}]   ;;  %s1139_s7 = inlined_call_operand.vmem [shape: f32[16,1], index: 7, kind: input, shape index: {}]   ;;  %s1140_s8 = inlined_call_operand.<no memory space> [shape: f32[1,1], index: 8, kind: input, shape index: {}]   ;;  %s1141_s9 = inlined_call_operand.hbm [shape: f32[1,1], index: 9, kind: output, shape index: {}]  }
   0x1   :  { %v14_v0 = vstv %s1140_s8 }
   0x2   :  { %15 = vst [vmem:[#allocation3] sm:$0x1] %v14_v0 }
   0x3   :  { %16 = vsyncpa [#allocation5], 0  ;;  %s1062_s11 = smov 0  }
   0x4 LB: > { %s1068_s12 = sadd.s32 4294967295, %s996_s11   ;;  %p871_p0 = scmp.ge.s32.totalorder %s996_s11, 1  ;;  %s996_s11 = sphi %s1062_s11, %s22_s11  }
   0x5   : > { %p294_p1 = scmp.lt.s32.totalorder %s996_s11, 5 }
   0x7   : > { %p295_p2 = pnand %p871_p0, %p294_p1 }
   0x8   : > { %p329_p3 = scmp.lt.s32.totalorder (!%p295_p2), %s1068_s12, 3  ;;  %p875_p4 = scmp.ne.s32.totalorder (!%p295_p2), %s1068_s12, 0 }
   0x9   : > { %298 = sbr.rel (%p295_p2) target bundleno = 1027 (0x403), region = 56 }
   0xe   : > { %s330_s8 = scalar_select %p329_p3, %s1068_s12, 3 }
   0xf   : > { %341 = sbr.rel (%p875_p4) target bundleno = 22 (0x16), region = 60 }
  0x10   : > { %s872_s13 = sshll.u32 %s330_s8, 3  ;;  %s889_s14 = sshll.u32 %s330_s8, 4 }
  0x11   : > { %s332_s17 = scalar_lea.vmem %s1132_s0, %s872_s13  ;;  %s337_s20 = scalar_lea.vmem %s1136_s4, %s889_s14 }
  0x14   : > { %vm342_vm0 = vcmask 253952   ;;  %v998_v1 = vmov 0.0  }
  0x15   : > { %343 = vst.msk [vmem:[#allocation2] sm:$0x1] %vm342_vm0, %v998_v1 }
  0x16 PF: > { %v344_v2 = vld [vmem:[%s332_s17] sm:$0xff]  ;;  %vm348_vm1 = vcmask 261120   ;;  %v999_v3 = vmov 0.0   ;;  %vm1000_vm2 = vmmov 0   ;;  %v1001_v7 = vmov 0   ;;  %v523_v9 = vld [vmem:[%s337_s20 + $0x8] sm:$0xff] }
  0x17   : > { %902 = vmatprep.subr.mxu0 %v999_v3  ;;  %907 = vmatprep.subr.mxu1 %v999_v3  ;;  %v347_v4 = vmul.f32 %v344_v2, %v344_v2  ;;  %v345_v5 = vld [vmem:[%s1133_s1] sm:$0xff]  ;;  %v1002_v8 = vmov 1.0   ;;  %v501_v11 = vlaneseq  ;;  %vm524_vm4 = vcmask 64512   ;;  %s1003_s25 = smov 64   ;;  %s1004_s26 = smov 96  }
  0x18   : > { %908 = vmatpush3.xpose.msk.msra.mxu1 %vm348_vm1, %v344_v2  ;;  %904 = vmatprep.mubr.msk.f32.mxu0 %vm1000_vm2, %v999_v3  ;;  %v346_v6 = vld [vmem:[%s1134_s2] sm:$0xff]  ;;  %s1005_s27 = smov 32   ;;  %vm636_vm6 = vcmask 253952   ;;  %p881_p5 = scmp.ne.s32.totalorder %s1068_s12, 3 }
  0x19   : > { %903 = vmatpush3.xpose.msk.msra.mxu0 %vm348_vm1, %v347_v4  ;;  %909 = vmatprep.mubr.msk.f32.mxu1 %vm1000_vm2, %v999_v3  ;;  %v522_v10 = vld [vmem:[%s337_s20] sm:$0xff]  ;;  %v502_v12 = vshrl.u32 %v501_v11, 7 }
  0x1a   : > { %955 = vset.pattern.permute.xlu0 %v1001_v7  ;;  %558 = vmatprep.subr.mxu0 %v523_v9 }
  0x1b   : > { %910 = vmatmul.mubr.msk.f32.vlgmr.msra.gmra.mxu1 %vm348_vm1, %v345_v5  ;;  %507 = vperm.xlu0 %955, %v346_v6   ;;  %v503_v13 = vsub.s32 0, %v502_v12 }
  0x1c   : > { %905 = vmatmul.mubr.msk.f32.vlgmr.msra.gmra.mxu0 %vm348_vm1, %v1002_v8  ;;  %v634_v50 = vld [vmem:[#allocation2] sm:$0x1] }
  0x1d   : > { %592 = vmatprep.mubr.f32.mxu0 %v999_v3  ;;  %559 = vmatpush1.msra.mxu0 %v522_v10 }
  0x96   : > { %v508_v16 = vpop.permute.xlu0 %507 }
  0xdb   : > { %v497_v14 = vpop.f32.mrf.mxu1 }
  0xdc   : > { %v421_v15 = vpop.f32.mrf.mxu0  ;;  %v511_v18 = vmul.f32 2.0, %v497_v14 }
  0xdd   : > { %v504_v17 = vrot.slane %v421_v15, %v503_v13  ;;  %v911_v19 = vpop.f32.mrf.mxu1 }
  0xde   : > { %v906_v20 = vpop.f32.mrf.mxu0 }
  0xdf   : > { %v510_v21 = vadd.f32 %v508_v16, %v504_v17 }
  0xe1   : > { %v512_v22 = vsub.f32 %v510_v21, %v511_v18 }
  0xe3   : > { %v513_v23 = vand.u32 2147483647, %v512_v22 }
  0xe5   : > { %v514_v24 = vadd.f32 1e-05, %v513_v23 }
  0xe7   : > { %956 = vrsqrt.f32 %v514_v24  ;;  %vm517_vm3 = vcmp.eq.f32.partialorder %v514_v24, inf  ;;  %v520_v27 = vand.u32 2147483648, %v514_v24  ;;  %vm519_vm5 = vcmp.eq.f32.partialorder %v514_v24, 0.0 }
  0xf4   : > { %v957_v25 = vpop.eup %956 }
  0xf5   : > { %v516_v26 = vmul.f32 %v957_v25, %v514_v24 }
  0xf7   : > { %v518_v28 = vsel %vm517_vm3, %v514_v24, %v516_v26 }
  0xf8   : > { %v521_v29 = vsel %vm519_vm5, %v520_v27, %v518_v28 }
  0xf9   : > { %880 = vmatmul.mubr.msk.f32.vlgmr.msra.gmra.mxu0 %vm524_vm4, %v521_v29 }
 0x1b9   : > { %v594_v30 = vpop.f32.mrf.mxu0 }
 0x1ba   : > { %v605_v31 = vrot.slane %v594_v30, 2  ;;  %v600_v32 = vrot.slane %v594_v30, 1  ;;  %v610_v35 = vrot.slane %v594_v30, 3 }
 0x1bb   : > { %v596_v33 = vpop.f32.mrf.mxu0 }
 0x1bc   : > { %606 = vrot.lane.b32.xlu1 %v605_v31, %s1003_s25  ;;  %601 = vrot.lane.b32.xlu0 %v600_v32, %s1004_s26  ;;  %v619_v34 = vrot.slane %v596_v33, 5  ;;  %v624_v36 = vrot.slane %v596_v33, 6  ;;  %v629_v37 = vrot.slane %v596_v33, 7  ;;  %v616_v43 = vrot.slane %v596_v33, 4 }
 0x1c0   : > { %611 = vrot.lane.b32.xlu1 %v610_v35, %s1005_s27  ;;  %620 = vrot.lane.b32.xlu0 %v619_v34, %s1004_s26 }
 0x1c4   : > { %625 = vrot.lane.b32.xlu1 %v624_v36, %s1003_s25  ;;  %630 = vrot.lane.b32.xlu0 %v629_v37, %s1005_s27 }
 0x22e   : > { %v607_v38 = vpop.permute.xlu1 %606  ;;  %v602_v39 = vpop.permute.xlu0 %601 }
 0x22f   : > { %v604_v40 = vadd.f32 %v602_v39, %v594_v30 }
 0x231   : > { %v609_v41 = vadd.f32 %v607_v38, %v604_v40 }
 0x232   : > { %v612_v42 = vpop.permute.xlu1 %611  ;;  %v621_v45 = vpop.permute.xlu0 %620 }
 0x233   : > { %v614_v44 = vadd.f32 %v612_v42, %v609_v41 }
 0x235   : > { %v618_v46 = vadd.f32 %v616_v43, %v614_v44 }
 0x236   : > { %v626_v48 = vpop.permute.xlu1 %625  ;;  %v631_v51 = vpop.permute.xlu0 %630 }
 0x237   : > { %v623_v47 = vadd.f32 %v621_v45, %v618_v46 }
 0x239   : > { %v628_v49 = vadd.f32 %v626_v48, %v623_v47 }
 0x23b   : > { %v633_v52 = vadd.f32 %v631_v51, %v628_v49  ;;  %641 = sbr.rel (%p881_p5) target bundleno = 1012 (0x3f4), region = 64 }
 0x23d   : > { %v635_v53 = vadd.f32 %v634_v50, %v633_v52 }
 0x23f   : > { %637 = vst.msk [vmem:[#allocation2] sm:$0x1] %vm636_vm6, %v635_v53 }
 0x240   : > { %v649_v54 = vld [vmem:[%s1137_s5 + $0x18] sm:$0xff]  ;;  %v1006_v55 = vmov 0.0   ;;  %v648_v56 = vld [vmem:[%s1137_s5 + $0x10] sm:$0xff]  ;;  %vm1007_vm7 = vmmov 0   ;;  %v643_v58 = vld [vmem:[%s1135_s3] sm:$0x1] }
 0x241   : > { %912 = vmatprep.subr.mxu0 %v1006_v55  ;;  %920 = vmatprep.mubr.msk.f32.mxu0 %vm1007_vm7, %v1006_v55  ;;  %v647_v60 = vld [vmem:[%s1137_s5 + $0x8] sm:$0xff]  ;;  %v646_v61 = vld [vmem:[%s1137_s5] sm:$0xff]  ;;  %vm728_vm8 = vcmask 130048   ;;  %vm808_vm9 = vcmask 0  }
 0x242   : > { %913 = vmatpush3.msra.mxu0 %v649_v54  ;;  %923 = vmatprep.subr.mxu1 %v1006_v55  ;;  %v726_v63 = vld [vmem:[%s1139_s7 + $0x8] sm:$0xff]  ;;  %v725_v0 = vld [vmem:[%s1139_s7] sm:$0xff] }
 0x243   : > { %914 = vmatprep.subr.mxu0 %v1006_v55  ;;  %927 = vmatprep.mubr.msk.f32.mxu1 %vm1007_vm7, %v1006_v55  ;;  %v650_v1 = vld [vmem:[%s1138_s6] sm:$0x1]  ;;  %v727_v6 = vld [vmem:[#allocation3] sm:$0x1] }
 0x244   : > { %915 = vmatpush3.msra.mxu0 %v648_v56  ;;  %924 = vmatpush3.msra.mxu1 %v726_v63 }
 0x245   : > { %916 = vmatprep.subr.mxu0 %v1006_v55  ;;  %925 = vmatprep.subr.mxu1 %v1006_v55 }
 0x246   : > { %v642_v57 = vld [vmem:[#allocation2] sm:$0x1]  ;;  %917 = vmatpush3.msra.mxu0 %v647_v60  ;;  %926 = vmatpush3.msra.mxu1 %v725_v0 }
 0x247   : > { %v644_v59 = vadd.f32 %v643_v58, %v642_v57  ;;  %918 = vmatprep.subr.mxu0 %v1006_v55 }
 0x248   : > { %919 = vmatpush3.msra.mxu0 %v646_v61 }
 0x249   : > { %v645_v62 = vmax.f32 %v644_v59, 0.0 }
 0x24b   : > { %921 = vmatmul.mubr.msk.f32.vlgmr.msra.gmra.mxu0 %vm348_vm1, %v645_v62 }
 0x30b   : > { %v720_v2 = vpop.f32.mrf.mxu0 }
 0x30c   : > { %v721_v3 = vadd.f32 %v720_v2, %v650_v1 }
 0x30d   : > { %v922_v4 = vpop.f32.mrf.mxu0 }
 0x30e   : > { %v724_v5 = vmax.f32 %v721_v3, 0.0 }
 0x310   : > { %928 = vmatmul.mubr.msk.f32.vlgmr.msra.gmra.mxu1 %vm728_vm8, %v724_v5 }
 0x3d0   : > { %v798_v7 = vpop.f32.mrf.mxu1 }
 0x3d1   : > { %v799_v8 = vadd.f32 %v798_v7, %v727_v6 }
 0x3d2   : > { %v929_v9 = vpop.f32.mrf.mxu1 }
 0x3d3   : > { %v884_v10 = vmul.f32 -1.442695, %v799_v8 }
 0x3d5   : > { %958 = vpow2.f32 %v884_v10 }
 0x3e2   : > { %v959_v11 = vpop.eup %958 }
 0x3e3   : > { %v805_v12 = vadd.f32 1.0, %v959_v11 }
 0x3e5   : > { %960 = vrcp.f32 %v805_v12 }
 0x3f2   : > { %v961_v13 = vpop.eup %960 }
 0x3f3   : > { %809 = vst.msk [vmem:[#allocation4] sm:$0x1] %vm808_vm9, %v961_v13 }
 0x3f4 PF: > { %p934_p6 = scmp.eq.s32.totalorder %s1068_s12, 3  ;;  %s1008_s24 = smov [#allocation4]  }
 0x3f5   : > { %s817_s25 = sshll.u32 %s1008_s24, 4  ;;  %s818_s25 = int_to_ptr.vmem [resolvable:$true] %s817_s25 }
 0x3f6   : > { %s962_s26 = scalar_lea.vmem %s818_s25, 16  ;;  %s968_s27 = scalar_lea.vmem %s818_s25, 32 }
 0x3f7   : > { %p963_p7 = scmp.ne.s32.totalorder %s818_s25, %s962_s26  ;;  %p969_p10 = scmp.lt.s32.totalorder %s818_s25, %s818_s25 }
 0x3f8   : > { %p970_p11 = scmp.lt.s32.totalorder %s968_s27, %s962_s26 }
 0x3f9   : > { %p964_p8 = pnand %p963_p7, %p934_p6 }
 0x3fa   : > { %p971_p12 = por %p970_p11, %p969_p10 }
 0x3fb   : > { %p965_p9 = pneg %p964_p8 }
 0x3fd   : > { %p972_p13 = pnand %p971_p12, %p965_p9 }
 0x3ff   : > { %975 = shalt.err (!%p972_p13)
}
 0x400   : > { %931 = dma.vmem_to_hbm [thread:$0]  (%p934_p6), %s818_s25, 16, %s1141_s9, [#allocation5]  }
 0x401   : > { %991 = dma.done.wait (%p934_p6), [#allocation5], 16  }
 0x402   : > { %993 = vsyncadd (%p934_p6), [#allocation5], 4294967280 }
 0x403 PF: > { %s22_s11 = sadd.s32 1, %s996_s11  }
 0x404   : > { %p19_p0 = scmp.ge.s32.totalorder %s22_s11, 6  }
 0x406   :  { %21 = sbr.rel (!%p19_p0) target bundleno = 4 (0x4), region = 94 }
 0x40b   :  { %830 = vsyncpa [#allocation5], 1 }
 0x40c   :  { %832 = vsyncpa [#allocation5 + $0x1], 1 }

</bundles_post_ra>
